<compile_context>
chip_gen: v6e
topology: v6e:2x2x1
jax: 0.10.0
libtpu: 0.0.40
codegen_flags: <defaults>
</compile_context>

<pallas_src>
import functools

import jax
import jax.numpy as jnp
from jax import lax
from jax.experimental import pallas as pl
from jax.experimental.pallas import tpu as pltpu


def _pick_batch_tile(B):
    # Largest batch tile <= 512 that divides B (multiple of 8 keeps f32
    # sublane tiling happy and bounds per-step VMEM for v7x's 64 MiB).
    for tb in (512, 256, 128, 64, 32, 16, 8):
        if B % tb == 0:
            return tb
    return B


def _supcon_head_kernel(drop_rate, tb, d, seed_ref, x_ref, w_ref, b_ref, o_ref):
    """Fused dropout -> linear head -> L2 row-normalize for one batch tile."""
    x = x_ref[...]                                            # [TB, D]

    if drop_rate > 0.0:  # static Python branch: training-mode dropout
        # Counter-based hash PRNG (splitmix32-ish), keyed on global element id.
        rows = lax.broadcasted_iota(jnp.int32, (tb, d), 0)
        cols = lax.broadcasted_iota(jnp.int32, (tb, d), 1)
        gid = ((pl.program_id(0) * tb + rows) * d + cols).astype(jnp.uint32)
        seed = seed_ref[0].astype(jnp.uint32)
        r = gid + seed * jnp.uint32(0x9E3779B9)
        r = (r ^ (r >> jnp.uint32(16))) * jnp.uint32(0x7FEB352D)
        r = (r ^ (r >> jnp.uint32(15))) * jnp.uint32(0x846CA68B)
        r = r ^ (r >> jnp.uint32(16))
        # Integer threshold: drop iff bits < round(p * 2^32)  (no float convert).
        thresh = jnp.uint32(min(int(round(drop_rate * (1 << 32))), (1 << 32) - 1))
        keep = r >= thresh
        scale = jnp.asarray(1.0 / (1.0 - drop_rate), dtype=x.dtype)
        x = jnp.where(keep, x * scale, jnp.zeros((), x.dtype))

    # Linear head on the MXU: [TB, D] @ [D, F] + [1, F]; f32 accumulation.
    # No explicit casts on the matmul operands: bf16 inputs feed the MXU
    # natively, f32 inputs go through the usual multi-pass path.
    y = jnp.dot(x, w_ref[...], preferred_element_type=jnp.float32)
    y = y + b_ref[...].astype(jnp.float32)

    # F.normalize(y, dim=1): rsqrt (EUP slot) + multiply (VPU) instead of
    # sqrt + full-width divide.  eps^2 clamp on the sum of squares.
    sumsq = jnp.sum(y * y, axis=1, keepdims=True)
    inv = lax.rsqrt(jnp.maximum(sumsq, jnp.float32(1e-24)))
    o_ref[...] = (y * inv).astype(o_ref.dtype)


def supcon_forward(last_hidden_state, w_head, b_head, *, drop_rate=0.0, seed=0):
    """last_hidden_state: [B, S, D]; w_head: [D, F]; b_head: [1, F] -> [B, F]."""
    B, S, D = last_hidden_state.shape
    D2, F = w_head.shape
    assert D == D2 and b_head.shape == (1, F)

    # Fuse the CLS slice into the kernel's DMA: view the contiguous row-major
    # activations as [B, S*D] (metadata-only reshape); a (TB, D) block at
    # column-block 0 is exactly the CLS-token slice, so no [B, D] copy is
    # ever materialized in HBM by an XLA slice.
    x2d = last_hidden_state.reshape(B, S * D)

    tb = _pick_batch_tile(B)
    grid = (B // tb,)
    seed_arr = jnp.array([seed], dtype=jnp.int32)
    kernel = functools.partial(_supcon_head_kernel, float(drop_rate), tb, D)

    bytes_accessed = (B * D * last_hidden_state.dtype.itemsize
                      + D * F * w_head.dtype.itemsize
                      + F * b_head.dtype.itemsize
                      + B * F * 4)
    cost = pl.CostEstimate(flops=2 * B * D * F,
                           transcendentals=B,
                           bytes_accessed=bytes_accessed)

    return pl.pallas_call(
        kernel,
        out_shape=jax.ShapeDtypeStruct((B, F), jnp.float32),
        grid_spec=pltpu.PrefetchScalarGridSpec(
            num_scalar_prefetch=1,            # dropout seed lives in SMEM
            grid=grid,
            in_specs=[
                # CLS tile: columns [0:D) of the [B, S*D] view, batch-tiled.
                pl.BlockSpec((tb, D), lambda i, seed: (i, 0)),
                # Head weight / bias pinned in VMEM across all batch tiles.
                pl.BlockSpec((D, F), lambda i, seed: (0, 0)),
                pl.BlockSpec((1, F), lambda i, seed: (0, 0)),
            ],
            out_specs=pl.BlockSpec((tb, F), lambda i, seed: (i, 0)),
        ),
        compiler_params=pltpu.CompilerParams(
            # Batch tiles are independent -> shard across TCs on v7x megacore.
            dimension_semantics=("parallel",)),
        cost_estimate=cost,
    )(seed_arr, x2d, w_head, b_head)


def _reference_no_dropout(last_hidden_state, w_head, b_head):
    cls_hidden = last_hidden_state[:, 0, :]
    y = cls_hidden @ w_head + b_head
    n = jnp.sqrt(jnp.sum(y * y, axis=1, keepdims=True))
    return y / jnp.maximum(n, 1e-12)


if __name__ == "__main__":
    # Small shapes consistent with the module: batch=8, seq=8,
    # embed_dim=256, feat_dim=128 (stand-ins for 768/768).
    B, S, D, FEAT = 8, 8, 256, 128
    DROP_RATE = 0.1

    key = jax.random.PRNGKey(0)
    k_h, k_w, k_b = jax.random.split(key, 3)

    # "Encoder output" stand-in (last_hidden_state) + deterministic head params.
    last_hidden_state = jax.random.normal(k_h, (B, S, D), dtype=jnp.float32)
    bound = 1.0 / float(D) ** 0.5
    w_head = jax.random.uniform(k_w, (D, FEAT), jnp.float32, -bound, bound)
    b_head = jax.random.uniform(k_b, (1, FEAT), jnp.float32, -bound, bound)

    # 1) Eval-mode (no dropout): must match the pure-JAX reference.
    out_eval = supcon_forward(last_hidden_state, w_head, b_head, drop_rate=0.0)
    jax.block_until_ready(out_eval)
    ref = _reference_no_dropout(last_hidden_state, w_head, b_head)
    assert out_eval.shape == (B, FEAT)
    assert jnp.allclose(out_eval, ref, atol=1e-5, rtol=1e-5)

    # 2) Training-mode (fused in-kernel dropout): rows unit-norm, finite, and
    #    genuinely different from the eval output (dropout took effect).
    out_train = supcon_forward(last_hidden_state, w_head, b_head,
                               drop_rate=DROP_RATE, seed=42)
    jax.block_until_ready(out_train)
    row_norms = jnp.sqrt(jnp.sum(out_train * out_train, axis=1))
    assert jnp.all(jnp.isfinite(out_train))
    assert jnp.allclose(row_norms, jnp.ones((B,)), atol=1e-4)
    assert not jnp.allclose(out_train, out_eval, atol=1e-4)

    print("KERNEL_OK")
</pallas_src>

<mosaic_0001>
module attributes {stable_mosaic.version = 11 : i64} {
  func.func @_supcon_head_kernel(%arg0: i32, %arg1: memref<1xi32, #tpu.memory_space<smem>>, %arg2: memref<8x256xf32, #tpu.memory_space<vmem>>, %arg3: memref<256x128xf32, #tpu.memory_space<vmem>>, %arg4: memref<1x128xf32, #tpu.memory_space<vmem>>, %arg5: memref<8x128xf32, #tpu.memory_space<vmem>>) attributes {dimension_semantics = [#tpu.dimension_semantics<parallel>], iteration_bounds = array<i64: 1>, scalar_prefetch = 1 : i64, scratch_operands = 0 : i64, tpu.core_type = #tpu.core_type<tc>, window_params = [{transform_indices = @transform_0, window_bounds = array<i64: 8, 256>}, {pipeline_mode = #tpu.pipeline_mode<synchronous>, transform_indices = @transform_1, window_bounds = array<i64: 256, 128>}, {pipeline_mode = #tpu.pipeline_mode<synchronous>, transform_indices = @transform_2, window_bounds = array<i64: 1, 128>}, {transform_indices = @transform_3, window_bounds = array<i64: 8, 128>}]} {
    %c0 = arith.constant 0 : index
    %c0_0 = arith.constant 0 : index
    %0 = vector.load %arg2[%c0, %c0_0] : memref<8x256xf32, #tpu.memory_space<vmem>>, vector<8x256xf32>
    %c0_1 = arith.constant 0 : index
    %c0_2 = arith.constant 0 : index
    %1 = vector.load %arg3[%c0_1, %c0_2] : memref<256x128xf32, #tpu.memory_space<vmem>>, vector<256x128xf32>
    %cst = arith.constant dense<0.000000e+00> : vector<8x128xf32>
    %2 = tpu.matmul %0, %1, %cst {dimension_numbers = #tpu.dot_dimension_numbers<[1], [0], [0], [1], [0, 0, 1, 1], [], []>} : vector<8x256xf32>, vector<256x128xf32>, vector<8x128xf32> -> vector<8x128xf32>
    %c0_3 = arith.constant 0 : index
    %c0_4 = arith.constant 0 : index
    %3 = vector.load %arg4[%c0_3, %c0_4] : memref<1x128xf32, #tpu.memory_space<vmem>>, vector<1x128xf32>
    %4 = vector.broadcast %3 : vector<1x128xf32> to vector<8x128xf32>
    %5 = arith.addf %2, %4 : vector<8x128xf32>
    %6 = arith.mulf %5, %5 : vector<8x128xf32>
    %cst_5 = arith.constant dense<0.000000e+00> : vector<8xf32>
    %7 = vector.multi_reduction <add>, %6, %cst_5 [1] : vector<8x128xf32> to vector<8xf32>
    %8 = vector.shape_cast %7 : vector<8xf32> to vector<8x1xf32>
    %cst_6 = arith.constant 1.000000e-24 : f32
    %9 = vector.broadcast %cst_6 : f32 to vector<8x1xf32>
    %10 = arith.maximumf %8, %9 : vector<8x1xf32>
    %11 = math.rsqrt %10 : vector<8x1xf32>
    %12 = vector.broadcast %11 : vector<8x1xf32> to vector<8x128xf32>
    %13 = arith.mulf %5, %12 : vector<8x128xf32>
    %c0_7 = arith.constant 0 : index
    %c0_8 = arith.constant 0 : index
    %14 = vector.load %arg5[%c0_7, %c0_8] : memref<8x128xf32, #tpu.memory_space<vmem>>, vector<8x128xf32>
    tpu.vector_store %arg5[%c0_7, %c0_8], %13 {strides = array<i32>} : memref<8x128xf32, #tpu.memory_space<vmem>>, vector<8x128xf32>,
    return
  }
  func.func @transform_0(%arg0: i32, %arg1: memref<1xi32, #tpu.memory_space<smem>>) -> (i32, i32) {
    %c0_i32 = arith.constant 0 : i32
    %c0_i32_0 = arith.constant 0 : i32
    return %arg0, %c0_i32 : i32, i32
  }
  func.func @transform_1(%arg0: i32, %arg1: memref<1xi32, #tpu.memory_space<smem>>) -> (i32, i32) {
    %c0_i32 = arith.constant 0 : i32
    %c0_i32_0 = arith.constant 0 : i32
    %c0_i32_1 = arith.constant 0 : i32
    return %c0_i32, %c0_i32_0 : i32, i32
  }
  func.func @transform_2(%arg0: i32, %arg1: memref<1xi32, #tpu.memory_space<smem>>) -> (i32, i32) {
    %c0_i32 = arith.constant 0 : i32
    %c0_i32_0 = arith.constant 0 : i32
    %c0_i32_1 = arith.constant 0 : i32
    return %c0_i32, %c0_i32_0 : i32, i32
  }
  func.func @transform_3(%arg0: i32, %arg1: memref<1xi32, #tpu.memory_space<smem>>) -> (i32, i32) {
    %c0_i32 = arith.constant 0 : i32
    %c0_i32_0 = arith.constant 0 : i32
    return %arg0, %c0_i32 : i32, i32
  }
}

</mosaic_0001>

<bundles_post_ra>
// kernel: tpu_custom_call.1
= control target key start
LH: loop header
LB: loop body
LE: loop exit
PB: predicated region body
PF: predicated region fallthrough
CT: control target
= control target key end

     0   :  { %10 = vsyncpa [#allocation5], 0  ;;  %s328_s0 = inlined_call_operand.<no memory space> [shape: s32[1], index: 0, kind: input, shape index: {}]   ;;  %s329_s1 = inlined_call_operand.hbm [shape: f32[8,2048], index: 1, kind: input, shape index: {}]   ;;  %s330_s2 = inlined_call_operand.hbm [shape: f32[256,128], index: 2, kind: input, shape index: {}]   ;;  %s331_s3 = inlined_call_operand.vmem [shape: f32[1,128], index: 3, kind: input, shape index: {}]   ;;  %s332_s4 = inlined_call_operand.hbm [shape: f32[8,128], index: 4, kind: output, shape index: {}]  }
   0x1   :  { %11 = vsyncpa [#allocation8], 0 }
   0x2   :  { %12 = vsyncpa [#allocation6], 0  ;;  %s286_s15 = smov [#allocation4]   ;;  %s287_s17 = smov [#allocation7]  }
   0x3   :  { %s19_s16 = sshll.u32 %s286_s15, 4  ;;  %s28_s18 = sshll.u32 %s287_s17, 4  ;;  %s20_s16 = int_to_ptr.vmem [resolvable:$true] %s19_s16  ;;  %s29_s18 = int_to_ptr.vmem [resolvable:$true] %s28_s18 }
   0x4   :  { %s228_s0 = scalar_lea.vmem %s20_s16, 256  ;;  %p233_p1 = scmp.lt.s32.totalorder %s20_s16, %s20_s16 }
   0x5   :  { %p229_p0 = scmp.ne.s32.totalorder %s20_s16, %s228_s0  ;;  %p234_p2 = scmp.lt.s32.totalorder %s228_s0, %s228_s0 }
   0x7   :  { %p235_p3 = por %p234_p2, %p233_p1 }
   0x9   :  { %p236_p4 = pnand %p235_p3, %p229_p0 }
   0xb   :  { %239 = shalt.err (!%p236_p4)
}
   0xc   :  { %22 = dma.hbm_to_vmem [thread:$0]  %s329_s1, 256, %s20_s16, [#allocation5]  }
   0xd   :  { %s248_s21 = scalar_lea.vmem %s29_s18, 4096  ;;  %p253_p6 = scmp.lt.s32.totalorder %s29_s18, %s29_s18 }
   0xe   :  { %p249_p5 = scmp.ne.s32.totalorder %s29_s18, %s248_s21  ;;  %p254_p7 = scmp.lt.s32.totalorder %s248_s21, %s248_s21 }
  0x10   :  { %p255_p8 = por %p254_p7, %p253_p6 }
  0x12   :  { %p256_p9 = pnand %p255_p8, %p249_p5 }
  0x14   :  { %259 = shalt.err (!%p256_p9)
}
  0x15   :  { %s288_s22 = smov 128   ;;  %s289_s23 = smov 8  }
  0x16   :  { %34 = dma.hbm_to_vmem [thread:$0]  %s330_s2, 4096, %s29_s18, [#allocation8], %s288_s22, %s288_s22, %s289_s23  }
  0x17   :  { %280 = dma.done.wait [#allocation5], 256  }
  0x18   :  { %281 = vsyncadd [#allocation5], 4294967040 }
  0x19   :  { %282 = dma.done.wait [#allocation8], 4096  }
  0x1a   :  { %283 = vsyncadd [#allocation8], 4294963200  ;;  %v76_v0 = vld [vmem:[#allocation7 + $0xf8] sm:$0xff]  ;;  %v75_v2 = vld [vmem:[#allocation7 + $0xf0] sm:$0xff]  ;;  %s290_s26 = smov [#allocation9]  }
  0x1b   :  { %v60_v1 = vld [vmem:[#allocation7 + $0x78] sm:$0xff]  ;;  %178 = vmatprep.subr.mxu0 %v76_v0  ;;  %v59_v3 = vld [vmem:[#allocation7 + $0x70] sm:$0xff]  ;;  %v74_v4 = vld [vmem:[#allocation7 + $0xe8] sm:$0xff]  ;;  %s167_s27 = sshll.u32 %s290_s26, 4  ;;  %s168_s27 = int_to_ptr.vmem [resolvable:$true] %s167_s27 }
  0x1c   :  { %179 = vmatpush3.msra.mxu0 %v60_v1  ;;  %v58_v5 = vld [vmem:[#allocation7 + $0x68] sm:$0xff]  ;;  %v73_v6 = vld [vmem:[#allocation7 + $0xe0] sm:$0xff]  ;;  %v72_v8 = vld [vmem:[#allocation7 + $0xd8] sm:$0xff]  ;;  %s260_s28 = scalar_lea.vmem %s168_s27, 128  ;;  %p265_p11 = scmp.lt.s32.totalorder %s168_s27, %s168_s27 }
  0x1d   :  { %180 = vmatprep.subr.mxu0 %v75_v2  ;;  %v57_v7 = vld [vmem:[#allocation7 + $0x60] sm:$0xff]  ;;  %v56_v9 = vld [vmem:[#allocation7 + $0x58] sm:$0xff]  ;;  %v71_v10 = vld [vmem:[#allocation7 + $0xd0] sm:$0xff]  ;;  %p261_p10 = scmp.ne.s32.totalorder %s168_s27, %s260_s28  ;;  %p266_p12 = scmp.lt.s32.totalorder %s260_s28, %s260_s28 }
  0x1e   :  { %181 = vmatpush3.msra.mxu0 %v59_v3  ;;  %v55_v11 = vld [vmem:[#allocation7 + $0x50] sm:$0xff]  ;;  %v70_v12 = vld [vmem:[#allocation7 + $0xc8] sm:$0xff]  ;;  %v44_v13 = vld [vmem:[#allocation4 + $0x8] sm:$0xff] }
  0x1f   :  { %182 = vmatprep.subr.mxu0 %v74_v4  ;;  %v54_v14 = vld [vmem:[#allocation7 + $0x48] sm:$0xff]  ;;  %148 = vmatprep.mubr.f32.mxu0 %v44_v13  ;;  %v69_v15 = vld [vmem:[#allocation7 + $0xc0] sm:$0xff]  ;;  %v68_v17 = vld [vmem:[#allocation7 + $0xb8] sm:$0xff]  ;;  %p267_p13 = por %p266_p12, %p265_p11 }
  0x20   :  { %183 = vmatpush3.msra.mxu0 %v58_v5  ;;  %v53_v16 = vld [vmem:[#allocation7 + $0x40] sm:$0xff]  ;;  %v52_v18 = vld [vmem:[#allocation7 + $0x38] sm:$0xff]  ;;  %v67_v19 = vld [vmem:[#allocation7 + $0xb0] sm:$0xff] }
  0x21   :  { %184 = vmatprep.subr.mxu0 %v73_v6  ;;  %v51_v20 = vld [vmem:[#allocation7 + $0x30] sm:$0xff]  ;;  %v66_v21 = vld [vmem:[#allocation7 + $0xa8] sm:$0xff]  ;;  %v65_v23 = vld [vmem:[#allocation7 + $0xa0] sm:$0xff]  ;;  %p268_p0 = pnand %p267_p13, %p261_p10 }
  0x22   :  { %185 = vmatpush3.msra.mxu0 %v57_v7  ;;  %v50_v22 = vld [vmem:[#allocation7 + $0x28] sm:$0xff]  ;;  %v49_v24 = vld [vmem:[#allocation7 + $0x20] sm:$0xff]  ;;  %v64_v25 = vld [vmem:[#allocation7 + $0x98] sm:$0xff] }
  0x23   :  { %186 = vmatprep.subr.mxu0 %v72_v8  ;;  %v48_v26 = vld [vmem:[#allocation7 + $0x18] sm:$0xff]  ;;  %v63_v27 = vld [vmem:[#allocation7 + $0x90] sm:$0xff]  ;;  %v62_v29 = vld [vmem:[#allocation7 + $0x88] sm:$0xff] }
  0x24   :  { %187 = vmatpush3.msra.mxu0 %v56_v9  ;;  %v47_v28 = vld [vmem:[#allocation7 + $0x10] sm:$0xff]  ;;  %v46_v30 = vld [vmem:[#allocation7 + $0x8] sm:$0xff]  ;;  %v61_v31 = vld [vmem:[#allocation7 + $0x80] sm:$0xff] }
  0x25   :  { %188 = vmatprep.subr.mxu0 %v71_v10  ;;  %v45_v32 = vld [vmem:[#allocation7] sm:$0xff]  ;;  %v43_v33 = vld [vmem:[#allocation4] sm:$0xff] }
  0x26   :  { %189 = vmatpush3.msra.mxu0 %v55_v11  ;;  %v177_v36 = vld [vmem:[%s331_s3] ss:$0 sm:$0xff] }
  0x27   :  { %190 = vmatprep.subr.mxu0 %v70_v12 }
  0x28   :  { %191 = vmatpush3.msra.mxu0 %v54_v14 }
  0x29   :  { %192 = vmatprep.subr.mxu0 %v69_v15 }
  0x2a   :  { %193 = vmatpush3.msra.mxu0 %v53_v16 }
  0x2b   :  { %194 = vmatprep.subr.mxu0 %v68_v17 }
  0x2c   :  { %195 = vmatpush3.msra.mxu0 %v52_v18 }
  0x2d   :  { %196 = vmatprep.subr.mxu0 %v67_v19 }
  0x2e   :  { %197 = vmatpush3.msra.mxu0 %v51_v20 }
  0x2f   :  { %198 = vmatprep.subr.mxu0 %v66_v21 }
  0x30   :  { %199 = vmatpush3.msra.mxu0 %v50_v22 }
  0x31   :  { %200 = vmatprep.subr.mxu0 %v65_v23 }
  0x32   :  { %201 = vmatpush3.msra.mxu0 %v49_v24 }
  0x33   :  { %202 = vmatprep.subr.mxu0 %v64_v25 }
  0x34   :  { %203 = vmatpush3.msra.mxu0 %v48_v26 }
  0x35   :  { %204 = vmatprep.subr.mxu0 %v63_v27 }
  0x36   :  { %205 = vmatpush3.msra.mxu0 %v47_v28 }
  0x37   :  { %206 = vmatprep.subr.mxu0 %v62_v29 }
  0x38   :  { %207 = vmatpush3.msra.mxu0 %v46_v30 }
  0x39   :  { %208 = vmatprep.subr.mxu0 %v61_v31 }
  0x3a   :  { %209 = vmatpush3.msra.mxu0 %v45_v32 }
  0x3b   :  { %149 = vmatmul.mubr.f32.vlgmr.msra.gmra.mxu0 %v43_v33 }
  0xfb   :  { %v210_v34 = vpop.f32.mrf.mxu0 }
  0xfd   :  { %v211_v35 = vpop.f32.mrf.mxu0 }
  0xfe   :  { %v212_v37 = vadd.f32 %v211_v35, %v210_v34 }
 0x100   :  { %v151_v38 = vadd.f32 %v212_v37, %v177_v36 }
 0x102   :  { %v154_v39 = vmul.f32 %v151_v38, %v151_v38 }
 0x104   :  { %155 = vadd.xlane.f32.xlu0 %v154_v39 }
 0x18d   :  { %v156_v40 = vpop.xlane.xlu0 %155 }
 0x18e   :  { %v157_v41 = vmax.f32 %v156_v40, 1e-24 }
 0x190   :  { %218 = vrsqrt.f32 %v157_v41 }
 0x19d   :  { %v219_v42 = vpop.eup %218 }
 0x19e   :  { %v159_v43 = vmul.f32 %v219_v42, %v151_v38 }
 0x1a0   :  { %160 = vst [vmem:[#allocation9] sm:$0xff] %v159_v43 }
 0x1a1   :  { %271 = shalt.err (!%p268_p0)
}
 0x1a2   :  { %170 = dma.vmem_to_hbm [thread:$0]  %s168_s27, 128, %s332_s4, [#allocation6]  }
 0x1a3   :  { %284 = dma.done.wait [#allocation6], 128  }
 0x1a4   :  { %285 = vsyncadd [#allocation6], 4294967168 }
 0x1a5   :  { %174 = vsyncpa [#allocation5], 1 }
 0x1a6   :  { %175 = vsyncpa [#allocation8], 1 }
 0x1a7   :  { %176 = vsyncpa [#allocation6], 1 }

</bundles_post_ra>
